<compile_context>
chip_gen: v7x
topology: tpu7x:2x2x1
jax: 0.10.0
libtpu: 0.0.40
codegen_flags: <defaults>
</compile_context>

<pallas_src>
import jax
import jax.numpy as jnp
from jax.experimental import pallas as pl
from jax.experimental.pallas import tpu as pltpu

INPUT_SIZE = 10
HIDDEN_SIZE = 20
OUTPUT_SIZE = 5


def rnn_kernel(x_ref, wih_ref, whh_ref, b_ref, wfc_ref, bfc_ref, out_ref):
    # x_ref: (S*B, I) time-major flattened input (rows t*B : (t+1)*B = timestep t)
    # wih_ref: (I, H)   whh_ref: (H, H)   b_ref: (1, H) = b_ih + b_hh
    # wfc_ref: (H, O)   bfc_ref: (1, O)   out_ref: (B, O)
    sb = x_ref.shape[0]
    b = out_ref.shape[0]
    s = sb // b

    # Time-independent input projection: one fat MXU call for all timesteps,
    # bias folded in.  Keeps the serial chain to just the h @ W_hh matmul + tanh.
    xproj = (jnp.dot(x_ref[...], wih_ref[...],
                     preferred_element_type=jnp.float32)
             + b_ref[...])                                   # (S*B, H)

    whh = whh_ref[...]                                       # (H, H), loaded once
    h = jnp.zeros((b, whh.shape[0]), jnp.float32)

    # Serial recurrence; S is static and small, so this fully unrolls and h
    # stays in vector registers (no VMEM scratch carry).
    for t in range(s):
        h = jnp.tanh(xproj[t * b:(t + 1) * b, :]
                     + jnp.dot(h, whh, preferred_element_type=jnp.float32))

    out_ref[...] = (jnp.dot(h, wfc_ref[...],
                            preferred_element_type=jnp.float32)
                    + bfc_ref[...]).astype(out_ref.dtype)


def rnn_forward(x, params):
    """x: (B, S, I) float32.  Returns (B, OUTPUT_SIZE) float32."""
    w_ih, w_hh, b_ih, b_hh, w_fc, b_fc = params
    B, S, I = x.shape
    H = w_hh.shape[0]
    O = w_fc.shape[0]

    # Wrapper-side glue: time-major flatten so each timestep is a contiguous row
    # block; pre-transpose weights for right-multiplication; fuse the two biases.
    x_flat = jnp.transpose(x, (1, 0, 2)).reshape(S * B, I)   # (S*B, I)
    wih_t = jnp.transpose(w_ih)                              # (I, H)
    whh_t = jnp.transpose(w_hh)                              # (H, H)
    wfc_t = jnp.transpose(w_fc)                              # (H, O)
    bias = (b_ih + b_hh).reshape(1, H)                       # fused RNN bias
    bfc = b_fc.reshape(1, O)

    vmem_spec = pl.BlockSpec(memory_space=pltpu.MemorySpace.VMEM)

    return pl.pallas_call(
        rnn_kernel,
        out_shape=jax.ShapeDtypeStruct((B, O), jnp.float32),
        in_specs=[vmem_spec] * 6,
        out_specs=vmem_spec,
    )(x_flat, wih_t, whh_t, bias, wfc_t, bfc)


def init_params(key):
    """Deterministic init mirroring PyTorch default U(-1/sqrt(H), 1/sqrt(H))."""
    ks = jax.random.split(key, 6)
    bound = 1.0 / jnp.sqrt(jnp.float32(HIDDEN_SIZE))
    w_ih = jax.random.uniform(ks[0], (HIDDEN_SIZE, INPUT_SIZE), jnp.float32,
                              -bound, bound)
    w_hh = jax.random.uniform(ks[1], (HIDDEN_SIZE, HIDDEN_SIZE), jnp.float32,
                              -bound, bound)
    b_ih = jax.random.uniform(ks[2], (HIDDEN_SIZE,), jnp.float32, -bound, bound)
    b_hh = jax.random.uniform(ks[3], (HIDDEN_SIZE,), jnp.float32, -bound, bound)
    w_fc = jax.random.uniform(ks[4], (OUTPUT_SIZE, HIDDEN_SIZE), jnp.float32,
                              -bound, bound)
    b_fc = jax.random.uniform(ks[5], (OUTPUT_SIZE,), jnp.float32, -bound, bound)
    return (w_ih, w_hh, b_ih, b_hh, w_fc, b_fc)


def rnn_reference(x, params):
    """Pure-JAX reference (same math) for a correctness sanity check."""
    w_ih, w_hh, b_ih, b_hh, w_fc, b_fc = params
    B = x.shape[0]
    h = jnp.zeros((B, HIDDEN_SIZE), jnp.float32)
    for t in range(x.shape[1]):
        h = jnp.tanh(x[:, t, :] @ w_ih.T + b_ih + h @ w_hh.T + b_hh)
    return h @ w_fc.T + b_fc


if __name__ == "__main__":
    key = jax.random.PRNGKey(0)
    k_x, k_p = jax.random.split(key)

    B, S = 2, 8
    x = jax.random.normal(k_x, (B, S, INPUT_SIZE), jnp.float32)
    params = init_params(k_p)

    out = rnn_forward(x, params)
    out = jax.block_until_ready(out)

    ref = rnn_reference(x, params)
    assert out.shape == (B, OUTPUT_SIZE)
    assert jnp.allclose(out, ref, atol=1e-5, rtol=1e-5)

    print("KERNEL_OK")
</pallas_src>

<mosaic_0001>
module attributes {stable_mosaic.version = 11 : i64} {
  func.func @rnn_kernel(%arg0: memref<16x10xf32, #tpu.memory_space<vmem>>, %arg1: memref<10x20xf32, #tpu.memory_space<vmem>>, %arg2: memref<20x20xf32, #tpu.memory_space<vmem>>, %arg3: memref<1x20xf32, #tpu.memory_space<vmem>>, %arg4: memref<20x5xf32, #tpu.memory_space<vmem>>, %arg5: memref<1x5xf32, #tpu.memory_space<vmem>>, %arg6: memref<2x5xf32, #tpu.memory_space<vmem>>) attributes {dimension_semantics = [], scalar_prefetch = 0 : i64, scratch_operands = 0 : i64, tpu.core_type = #tpu.core_type<tc>} {
    %c0 = arith.constant 0 : index
    %c0_0 = arith.constant 0 : index
    %0 = vector.load %arg0[%c0, %c0_0] : memref<16x10xf32, #tpu.memory_space<vmem>>, vector<16x10xf32>
    %c0_1 = arith.constant 0 : index
    %c0_2 = arith.constant 0 : index
    %1 = vector.load %arg1[%c0_1, %c0_2] : memref<10x20xf32, #tpu.memory_space<vmem>>, vector<10x20xf32>
    %cst = arith.constant dense<0.000000e+00> : vector<16x20xf32>
    %2 = tpu.matmul %0, %1, %cst {dimension_numbers = #tpu.dot_dimension_numbers<[1], [0], [0], [1], [0, 0, 1, 1], [], []>} : vector<16x10xf32>, vector<10x20xf32>, vector<16x20xf32> -> vector<16x20xf32>
    %c0_3 = arith.constant 0 : index
    %c0_4 = arith.constant 0 : index
    %3 = vector.load %arg3[%c0_3, %c0_4] : memref<1x20xf32, #tpu.memory_space<vmem>>, vector<1x20xf32>
    %4 = vector.broadcast %3 : vector<1x20xf32> to vector<16x20xf32>
    %5 = arith.addf %2, %4 : vector<16x20xf32>
    %c0_5 = arith.constant 0 : index
    %c0_6 = arith.constant 0 : index
    %6 = vector.load %arg2[%c0_5, %c0_6] : memref<20x20xf32, #tpu.memory_space<vmem>>, vector<20x20xf32>
    %cst_7 = arith.constant 0.000000e+00 : f32
    %7 = vector.broadcast %cst_7 : f32 to vector<2x20xf32>
    %8 = vector.extract_strided_slice %5 {offsets = [0, 0], sizes = [2, 20], strides = [1, 1]} : vector<16x20xf32> to vector<2x20xf32>
    %cst_8 = arith.constant dense<0.000000e+00> : vector<2x20xf32>
    %9 = tpu.matmul %7, %6, %cst_8 {dimension_numbers = #tpu.dot_dimension_numbers<[1], [0], [0], [1], [0, 0, 1, 1], [], []>} : vector<2x20xf32>, vector<20x20xf32>, vector<2x20xf32> -> vector<2x20xf32>
    %10 = arith.addf %8, %9 : vector<2x20xf32>
    %11 = math.tanh %10 : vector<2x20xf32>
    %12 = vector.extract_strided_slice %5 {offsets = [2, 0], sizes = [2, 20], strides = [1, 1]} : vector<16x20xf32> to vector<2x20xf32>
    %cst_9 = arith.constant dense<0.000000e+00> : vector<2x20xf32>
    %13 = tpu.matmul %11, %6, %cst_9 {dimension_numbers = #tpu.dot_dimension_numbers<[1], [0], [0], [1], [0, 0, 1, 1], [], []>} : vector<2x20xf32>, vector<20x20xf32>, vector<2x20xf32> -> vector<2x20xf32>
    %14 = arith.addf %12, %13 : vector<2x20xf32>
    %15 = math.tanh %14 : vector<2x20xf32>
    %16 = vector.extract_strided_slice %5 {offsets = [4, 0], sizes = [2, 20], strides = [1, 1]} : vector<16x20xf32> to vector<2x20xf32>
    %cst_10 = arith.constant dense<0.000000e+00> : vector<2x20xf32>
    %17 = tpu.matmul %15, %6, %cst_10 {dimension_numbers = #tpu.dot_dimension_numbers<[1], [0], [0], [1], [0, 0, 1, 1], [], []>} : vector<2x20xf32>, vector<20x20xf32>, vector<2x20xf32> -> vector<2x20xf32>
    %18 = arith.addf %16, %17 : vector<2x20xf32>
    %19 = math.tanh %18 : vector<2x20xf32>
    %20 = vector.extract_strided_slice %5 {offsets = [6, 0], sizes = [2, 20], strides = [1, 1]} : vector<16x20xf32> to vector<2x20xf32>
    %cst_11 = arith.constant dense<0.000000e+00> : vector<2x20xf32>
    %21 = tpu.matmul %19, %6, %cst_11 {dimension_numbers = #tpu.dot_dimension_numbers<[1], [0], [0], [1], [0, 0, 1, 1], [], []>} : vector<2x20xf32>, vector<20x20xf32>, vector<2x20xf32> -> vector<2x20xf32>
    %22 = arith.addf %20, %21 : vector<2x20xf32>
    %23 = math.tanh %22 : vector<2x20xf32>
    %24 = vector.extract_strided_slice %5 {offsets = [8, 0], sizes = [2, 20], strides = [1, 1]} : vector<16x20xf32> to vector<2x20xf32>
    %cst_12 = arith.constant dense<0.000000e+00> : vector<2x20xf32>
    %25 = tpu.matmul %23, %6, %cst_12 {dimension_numbers = #tpu.dot_dimension_numbers<[1], [0], [0], [1], [0, 0, 1, 1], [], []>} : vector<2x20xf32>, vector<20x20xf32>, vector<2x20xf32> -> vector<2x20xf32>
    %26 = arith.addf %24, %25 : vector<2x20xf32>
    %27 = math.tanh %26 : vector<2x20xf32>
    %28 = vector.extract_strided_slice %5 {offsets = [10, 0], sizes = [2, 20], strides = [1, 1]} : vector<16x20xf32> to vector<2x20xf32>
    %cst_13 = arith.constant dense<0.000000e+00> : vector<2x20xf32>
    %29 = tpu.matmul %27, %6, %cst_13 {dimension_numbers = #tpu.dot_dimension_numbers<[1], [0], [0], [1], [0, 0, 1, 1], [], []>} : vector<2x20xf32>, vector<20x20xf32>, vector<2x20xf32> -> vector<2x20xf32>
    %30 = arith.addf %28, %29 : vector<2x20xf32>
    %31 = math.tanh %30 : vector<2x20xf32>
    %32 = vector.extract_strided_slice %5 {offsets = [12, 0], sizes = [2, 20], strides = [1, 1]} : vector<16x20xf32> to vector<2x20xf32>
    %cst_14 = arith.constant dense<0.000000e+00> : vector<2x20xf32>
    %33 = tpu.matmul %31, %6, %cst_14 {dimension_numbers = #tpu.dot_dimension_numbers<[1], [0], [0], [1], [0, 0, 1, 1], [], []>} : vector<2x20xf32>, vector<20x20xf32>, vector<2x20xf32> -> vector<2x20xf32>
    %34 = arith.addf %32, %33 : vector<2x20xf32>
    %35 = math.tanh %34 : vector<2x20xf32>
    %36 = vector.extract_strided_slice %5 {offsets = [14, 0], sizes = [2, 20], strides = [1, 1]} : vector<16x20xf32> to vector<2x20xf32>
    %cst_15 = arith.constant dense<0.000000e+00> : vector<2x20xf32>
    %37 = tpu.matmul %35, %6, %cst_15 {dimension_numbers = #tpu.dot_dimension_numbers<[1], [0], [0], [1], [0, 0, 1, 1], [], []>} : vector<2x20xf32>, vector<20x20xf32>, vector<2x20xf32> -> vector<2x20xf32>
    %38 = arith.addf %36, %37 : vector<2x20xf32>
    %39 = math.tanh %38 : vector<2x20xf32>
    %c0_16 = arith.constant 0 : index
    %c0_17 = arith.constant 0 : index
    %40 = vector.load %arg4[%c0_16, %c0_17] : memref<20x5xf32, #tpu.memory_space<vmem>>, vector<20x5xf32>
    %cst_18 = arith.constant dense<0.000000e+00> : vector<2x5xf32>
    %41 = tpu.matmul %39, %40, %cst_18 {dimension_numbers = #tpu.dot_dimension_numbers<[1], [0], [0], [1], [0, 0, 1, 1], [], []>} : vector<2x20xf32>, vector<20x5xf32>, vector<2x5xf32> -> vector<2x5xf32>
    %c0_19 = arith.constant 0 : index
    %c0_20 = arith.constant 0 : index
    %42 = vector.load %arg5[%c0_19, %c0_20] : memref<1x5xf32, #tpu.memory_space<vmem>>, vector<1x5xf32>
    %43 = vector.broadcast %42 : vector<1x5xf32> to vector<2x5xf32>
    %44 = arith.addf %41, %43 : vector<2x5xf32>
    %c0_21 = arith.constant 0 : index
    %c0_22 = arith.constant 0 : index
    %45 = vector.load %arg6[%c0_21, %c0_22] : memref<2x5xf32, #tpu.memory_space<vmem>>, vector<2x5xf32>
    tpu.vector_store %arg6[%c0_21, %c0_22], %44 {strides = array<i32>} : memref<2x5xf32, #tpu.memory_space<vmem>>, vector<2x5xf32>,
    return
  }
}

</mosaic_0001>

<bundles_post_ra>
// kernel: tpu_custom_call.1
= control target key start
LH: loop header
LB: loop body
LE: loop exit
PB: predicated region body
PF: predicated region fallthrough
CT: control target
= control target key end

     0   :  { %11 = vsyncpa [#allocation3], 0  ;;  %s1351_s0 = inlined_call_operand.hbm [shape: f32[16,10], index: 0, kind: input, shape index: {}]   ;;  %s1352_s1 = inlined_call_operand.hbm [shape: f32[10,20], index: 1, kind: input, shape index: {}]   ;;  %s1353_s2 = inlined_call_operand.vmem [shape: f32[20,20], index: 2, kind: input, shape index: {}]   ;;  %s1354_s3 = inlined_call_operand.vmem [shape: f32[1,20], index: 3, kind: input, shape index: {}]   ;;  %s1355_s4 = inlined_call_operand.vmem [shape: f32[20,5], index: 4, kind: input, shape index: {}]   ;;  %s1356_s5 = inlined_call_operand.vmem [shape: f32[1,5], index: 5, kind: input, shape index: {}]   ;;  %s1357_s6 = inlined_call_operand.hbm [shape: f32[2,5], index: 6, kind: output, shape index: {}]  }
   0x1   :  { %12 = vsyncpa [#allocation6], 0 }
   0x2   :  { %13 = vsyncpa [#allocation4], 0  ;;  %s1165_s21 = smov [#allocation2]   ;;  %s1093_s25 = scalar_lea.hbm %s1351_s0, 256 }
   0x3   :  { %s19_s22 = sshll.u32 %s1165_s21, 4  ;;  %p1094_p0 = scmp.ne.s32.totalorder %s1351_s0, %s1093_s25  ;;  %s20_s22 = int_to_ptr.vmem [resolvable:$true] %s19_s22 }
   0x4   :  { %p1097_p1 = scmp.lt.u32.totalorder %s1093_s25, %s1351_s0 }
   0x6   :  { %p1099_p2 = pnand %p1097_p1, %p1094_p0 }
   0x8   :  { %1102 = shalt.err (!%p1099_p2)
}
   0x9   :  { %s1103_s30 = scalar_lea.vmem %s20_s22, 256  ;;  %p1108_p4 = scmp.lt.s32.totalorder %s20_s22, %s20_s22 }
   0xa   :  { %p1104_p3 = scmp.ne.s32.totalorder %s20_s22, %s1103_s30  ;;  %p1109_p5 = scmp.lt.s32.totalorder %s1103_s30, %s1103_s30 }
   0xc   :  { %p1110_p6 = por %p1109_p5, %p1108_p4 }
   0xe   :  { %p1111_p7 = pnand %p1110_p6, %p1104_p3 }
  0x10   :  { %1114 = shalt.err (!%p1111_p7)
}
  0x11   :  { %s1166_s7 = smov 128   ;;  %s1167_s8 = smov 8  }
  0x12   :  { %25 = dma.hbm_to_vmem [thread:$0]  %s1351_s0, 256, %s20_s22, [#allocation3], %s1166_s7, %s1166_s7, %s1167_s8  }
  0x13   :  { %s1168_s11 = smov [#allocation5]   ;;  %s1115_s15 = scalar_lea.hbm %s1352_s1, 256 }
  0x14   :  { %s31_s12 = sshll.u32 %s1168_s11, 4  ;;  %p1116_p8 = scmp.ne.s32.totalorder %s1352_s1, %s1115_s15  ;;  %s32_s12 = int_to_ptr.vmem [resolvable:$true] %s31_s12 }
  0x15   :  { %p1119_p9 = scmp.lt.u32.totalorder %s1115_s15, %s1352_s1 }
  0x17   :  { %p1121_p10 = pnand %p1119_p9, %p1116_p8 }
  0x19   :  { %1124 = shalt.err (!%p1121_p10)
}
  0x1a   :  { %s1125_s20 = scalar_lea.vmem %s32_s12, 256  ;;  %p1130_p12 = scmp.lt.s32.totalorder %s32_s12, %s32_s12 }
  0x1b   :  { %p1126_p11 = scmp.ne.s32.totalorder %s32_s12, %s1125_s20  ;;  %p1131_p13 = scmp.lt.s32.totalorder %s1125_s20, %s1125_s20 }
  0x1d   :  { %p1132_p0 = por %p1131_p13, %p1130_p12 }
  0x1f   :  { %p1133_p1 = pnand %p1132_p0, %p1126_p11 }
  0x21   :  { %1136 = shalt.err (!%p1133_p1)
}
  0x22   :  { %37 = dma.hbm_to_vmem [thread:$0]  %s1352_s1, 256, %s32_s12, [#allocation6], %s1166_s7, %s1166_s7, %s1167_s8  }
  0x23   :  { %1159 = dma.done.wait [#allocation3], 256  }
  0x24   :  { %1160 = vsyncadd [#allocation3], 4294967040 }
  0x25   :  { %1161 = dma.done.wait [#allocation6], 256  }
  0x26   :  { %1162 = vsyncadd [#allocation6], 4294967040  ;;  %v1169_v0 = vmov 0.0|0.0   ;;  %vm1170_vm0 = vmmov 0   ;;  %v1171_v1 = vmov 0.0   ;;  %vm70_vm1 = vcmask 1041408  }
  0x27   :  { %1041 = vmatprep.subr.bf16.mxu1 %v1169_v0  ;;  %960 = vmatprep.mubr.msk.f32.mxu1 %vm1170_vm0, %v1171_v1  ;;  %vm1172_vm2 = vmmov 1   ;;  %vm63_vm4 = vcmask 80896   ;;  %v54_v2 = vld [vmem:[#allocation5] sm:$0xff]  ;;  %v55_v3 = vld [vmem:[#allocation5 + $0x8] sm:$0x3]  ;;  %v149_v4 = vld [vmem:[%s1353_s2] sm:$0xff] }
  0x28   :  { %vm1036_vm3 = vmpackc.low %vm70_vm1, %vm1172_vm2  ;;  %v1035_v5 = vpack.c.bf16 %v55_v3, %v54_v2  ;;  %v150_v6 = vld [vmem:[%s1353_s2 + $0x8] sm:$0xff]  ;;  %v52_v7 = vld [vmem:[#allocation2] sm:$0xff]  ;;  %vm156_vm5 = vcmask 1043456   ;;  %vm152_vm6 = vcmask 162816   ;;  %s1173_s11 = smov [#allocation7]   ;;  %vm867_vm7 = vcmask 33792  }
  0x29   :  { %v1242_v8 = vpack.c.bf16 %v150_v6, %v149_v4  ;;  %951 = vmatprep.mubr.msk.f32.mxu0 %vm63_vm4, %v52_v7  ;;  %v53_v9 = vld [vmem:[#allocation2 + $0x8] sm:$0xff]  ;;  %v1250_v10 = vld [vmem:[%s1353_s2 + $0x10] sm:$0xf]  ;;  %v885_v11 = vld [vmem:[%s1354_s3] ss:$0 sm:$0xff]  ;;  %s875_s12 = sshll.u32 %s1173_s11, 4  ;;  %s876_s12 = int_to_ptr.vmem [resolvable:$true] %s875_s12 }
  0x2a   :  { %1037 = vmatprep.subr.msk.bf16.mxu0 %vm1036_vm3, %v1035_v5  ;;  %v780_v54 = vld [vmem:[%s1355_s4] sm:$0xff]  ;;  %v781_v55 = vld [vmem:[%s1355_s4 + $0x8] sm:$0xff]  ;;  %v782_v57 = vld [vmem:[%s1355_s4 + $0x10] sm:$0xf]  ;;  %s1137_s4 = scalar_lea.vmem %s876_s12, 32  ;;  %p1142_p3 = scmp.lt.s32.totalorder %s876_s12, %s876_s12 }
  0x2b   :  { %1040 = vmatpush3.bf16.msk.msra.mxu0 %vm1036_vm3, %v1035_v5  ;;  %1043 = vmatpush3.bf16.msra.mxu1 %v1242_v8  ;;  %v1066_v56 = vpack.c.bf16 %v781_v55, %v780_v54  ;;  %p1138_p2 = scmp.ne.s32.totalorder %s876_s12, %s1137_s4  ;;  %p1143_p4 = scmp.lt.s32.totalorder %s1137_s4, %s1137_s4 }
  0x2c   :  { %958 = vmatprep.subr.mxu1 %v1171_v1  ;;  %1044 = vmatprep.subr.bf16.mxu0 %v1169_v0 }
  0x2d   :  { %p1144_p5 = por %p1143_p4, %p1142_p3 }
  0x2e   :  { %952 = vmatmul.mubr.msk.f32.vlgmr.msra.gmra.mrb[0].mxu0 %vm63_vm4, %v53_v9 }
  0x2f   :  { %959 = vmatpush3.msk.msra.mxu1 %vm156_vm5, %v1250_v10  ;;  %1046 = vmatpush3.bf16.msra.mxu0 %v1242_v8  ;;  %p1145_p6 = pnand %p1144_p5, %p1138_p2 }
  0x30   :  { %961 = vmatmul.mubr.f32.vlgmr.msra.gmra.mrb[0].mxu1 %v1171_v1  ;;  %967 = vmatprep.subr.mxu0 %v1171_v1 }
  0x31   :  { %969 = vmatprep.mubr.msk.f32.mxu0 %vm1170_vm0, %v1171_v1  ;;  %1047 = vmatprep.subr.bf16.mxu1 %v1169_v0 }
  0x32   :  { %1049 = vmatpush3.bf16.msra.mxu1 %v1242_v8  ;;  %978 = vmatprep.mubr.msk.f32.mxu1 %vm1170_vm0, %v1171_v1 }
  0x33   :  { %968 = vmatpush3.msk.msra.mxu0 %vm156_vm5, %v1250_v10  ;;  %976 = vmatprep.subr.mxu1 %v1171_v1 }
  0x34   :  { %1050 = vmatprep.subr.bf16.mxu0 %v1169_v0 }
  0x36   :  { %977 = vmatpush3.msk.msra.mxu1 %vm156_vm5, %v1250_v10 }
  0x37   :  { %1053 = vmatprep.subr.bf16.mxu1 %v1169_v0 }
 0x101   :  { %v953_v12 = vpop.f32.mrb[0].mxu0 }
 0x102   :  { %v1275_v13 = vadd.f32 %v953_v12, %v885_v11  ;;  %v140_v14 = vpop.f32.mrb[1].mxu0 }
 0x103   :  { %v141_v15 = vadd.f32 %v885_v11, %v140_v14  ;;  %v226_v16 = vpop.f32.mrb[0].mxu1 }
 0x104   :  { %v962_v17 = vpop.f32.mrb[1].mxu1 }
 0x105   :  { %v230_v18 = vadd.f32 %v226_v16, %v141_v15 }
 0x107   :  { %1077 = vtanh.f32 %v230_v18 }
 0x111   :  { %v1078_v19 = vpop.eup %1077 }
 0x112   :  { %970 = vmatmul.mubr.msk.f32.vlgmr.msra.gmra.mrb[2].mxu0 %vm152_vm6, %v1078_v19 }
 0x113   :  { %1052 = vmatpush3.bf16.msra.mxu0 %v1242_v8  ;;  %987 = vmatprep.mubr.msk.f32.mxu0 %vm1170_vm0, %v1171_v1 }
 0x114   :  { %985 = vmatprep.subr.mxu0 %v1171_v1 }
 0x117   :  { %986 = vmatpush3.msk.msra.mxu0 %vm156_vm5, %v1250_v10 }
 0x118   :  { %1056 = vmatprep.subr.bf16.mxu0 %v1169_v0 }
 0x1e5   :  { %v301_v20 = vpop.f32.mrb[2].mxu0 }
 0x1e6   :  { %v306_v21 = vrot.slane %v301_v20, 6  ;;  %v971_v22 = vpop.f32.mrb[3].mxu0 }
 0x1e8   :  { %v308_v23 = vadd.f32 %v306_v21, %v141_v15 }
 0x1ea   :  { %1079 = vtanh.f32 %v308_v23 }
 0x1f4   :  { %v1080_v24 = vpop.eup %1079 }
 0x1f5   :  { %v311_v25 = vrot.slane %v1080_v24, 2 }
 0x1f7   :  { %979 = vmatmul.mubr.msk.f32.vlgmr.msra.gmra.mrb[2].mxu1 %vm152_vm6, %v311_v25 }
 0x1f8   :  { %1055 = vmatpush3.bf16.msra.mxu1 %v1242_v8  ;;  %996 = vmatprep.mubr.msk.f32.mxu1 %vm1170_vm0, %v1171_v1 }
 0x1f9   :  { %994 = vmatprep.subr.mxu1 %v1171_v1 }
 0x1fc   :  { %995 = vmatpush3.msk.msra.mxu1 %vm156_vm5, %v1250_v10 }
 0x1fd   :  { %1059 = vmatprep.subr.bf16.mxu1 %v1169_v0 }
 0x2ca   :  { %v380_v26 = vpop.f32.mrb[2].mxu1 }
 0x2cb   :  { %v385_v27 = vrot.slane %v380_v26, 4  ;;  %v980_v28 = vpop.f32.mrb[3].mxu1 }
 0x2cd   :  { %v387_v29 = vadd.f32 %v385_v27, %v141_v15 }
 0x2cf   :  { %1081 = vtanh.f32 %v387_v29 }
 0x2d9   :  { %v1082_v30 = vpop.eup %1081 }
 0x2da   :  { %v390_v31 = vrot.slane %v1082_v30, 4 }
 0x2dc   :  { %988 = vmatmul.mubr.msk.f32.vlgmr.msra.gmra.mrb[4].mxu0 %vm152_vm6, %v390_v31 }
 0x2dd   :  { %1058 = vmatpush3.bf16.msra.mxu0 %v1242_v8  ;;  %1005 = vmatprep.mubr.msk.f32.mxu0 %vm1170_vm0, %v1171_v1 }
 0x2de   :  { %1003 = vmatprep.subr.mxu0 %v1171_v1 }
 0x2e1   :  { %1004 = vmatpush3.msk.msra.mxu0 %vm156_vm5, %v1250_v10 }
 0x2e2   :  { %1062 = vmatprep.subr.bf16.mxu0 %v1169_v0 }
 0x3af   :  { %v459_v32 = vpop.f32.mrb[4].mxu0 }
 0x3b0   :  { %v464_v33 = vrot.slane %v459_v32, 2  ;;  %v989_v34 = vpop.f32.mrb[5].mxu0 }
 0x3b2   :  { %v466_v35 = vadd.f32 %v464_v33, %v141_v15 }
 0x3b4   :  { %1083 = vtanh.f32 %v466_v35 }
 0x3be   :  { %v1084_v36 = vpop.eup %1083 }
 0x3bf   :  { %v469_v37 = vrot.slane %v1084_v36, 6 }
 0x3c1   :  { %997 = vmatmul.mubr.msk.f32.vlgmr.msra.gmra.mrb[4].mxu1 %vm152_vm6, %v469_v37 }
 0x3c2   :  { %1061 = vmatpush3.bf16.msra.mxu1 %v1242_v8  ;;  %1014 = vmatprep.mubr.msk.f32.mxu1 %vm1170_vm0, %v1171_v1 }
 0x3c3   :  { %1012 = vmatprep.subr.mxu1 %v1171_v1 }
 0x3c6   :  { %1013 = vmatpush3.msk.msra.mxu1 %vm156_vm5, %v1250_v10 }
 0x3c7   :  { %1065 = vmatprep.subr.bf16.mxu1 %v1169_v0  ;;  %v904_v0 = vld [vmem:[%s1356_s5] ss:$0 sm:$0xff] }
 0x494   :  { %v538_v38 = vpop.f32.mrb[4].mxu1 }
 0x495   :  { %v542_v39 = vadd.f32 %v538_v38, %v1275_v13  ;;  %v998_v40 = vpop.f32.mrb[5].mxu1 }
 0x497   :  { %1085 = vtanh.f32 %v542_v39 }
 0x4a1   :  { %v1086_v41 = vpop.eup %1085 }
 0x4a2   :  { %1006 = vmatmul.mubr.msk.f32.vlgmr.msra.gmra.mrb[6].mxu0 %vm152_vm6, %v1086_v41 }
 0x4a3   :  { %1064 = vmatpush3.bf16.msra.mxu0 %v1242_v8  ;;  %1023 = vmatprep.mubr.msk.f32.mxu0 %vm1170_vm0, %v1171_v1 }
 0x4a4   :  { %1021 = vmatprep.subr.mxu0 %v1171_v1 }
 0x4a7   :  { %1022 = vmatpush3.msk.msra.mxu0 %vm156_vm5, %v1250_v10 }
 0x575   :  { %v613_v42 = vpop.f32.mrb[6].mxu0 }
 0x576   :  { %v618_v43 = vrot.slane %v613_v42, 6  ;;  %v1007_v44 = vpop.f32.mrb[7].mxu0 }
 0x578   :  { %v620_v45 = vadd.f32 %v618_v43, %v1275_v13 }
 0x57a   :  { %1087 = vtanh.f32 %v620_v45 }
 0x584   :  { %v1088_v46 = vpop.eup %1087 }
 0x585   :  { %v623_v47 = vrot.slane %v1088_v46, 2 }
 0x587   :  { %1015 = vmatmul.mubr.msk.f32.vlgmr.msra.gmra.mrb[6].mxu1 %vm152_vm6, %v623_v47 }
 0x588   :  { %1032 = vmatprep.mubr.msk.f32.mxu1 %vm1170_vm0, %v1171_v1  ;;  %1067 = vmatpush3.bf16.msra.mxu1 %v1066_v56 }
 0x589   :  { %1030 = vmatprep.subr.mxu1 %v1171_v1 }
 0x58c   :  { %1031 = vmatpush3.msk.msra.mxu1 %vm156_vm5, %v782_v57 }
 0x65a   :  { %v692_v48 = vpop.f32.mrb[6].mxu1 }
 0x65b   :  { %v697_v49 = vrot.slane %v692_v48, 4  ;;  %v1016_v50 = vpop.f32.mrb[7].mxu1 }
 0x65d   :  { %v699_v51 = vadd.f32 %v697_v49, %v1275_v13 }
 0x65f   :  { %1089 = vtanh.f32 %v699_v51 }
 0x669   :  { %v1090_v52 = vpop.eup %1089 }
 0x66a   :  { %v702_v53 = vrot.slane %v1090_v52, 4 }
 0x66c   :  { %1024 = vmatmul.mubr.msk.f32.vlgmr.msra.gmra.mrb[8].mxu0 %vm152_vm6, %v702_v53 }
 0x73f   :  { %v771_v58 = vpop.f32.mrb[8].mxu0 }
 0x740   :  { %v776_v59 = vrot.slane %v771_v58, 2  ;;  %v1025_v60 = vpop.f32.mrb[9].mxu0 }
 0x742   :  { %v778_v61 = vadd.f32 %v776_v59, %v1275_v13 }
 0x744   :  { %1091 = vtanh.f32 %v778_v61 }
 0x74e   :  { %v1092_v62 = vpop.eup %1091 }
 0x74f   :  { %v791_v63 = vrot.slane %v1092_v62, 6 }
 0x751   :  { %1033 = vmatmul.mubr.msk.f32.vlgmr.msra.gmra.mrb[8].mxu1 %vm152_vm6, %v791_v63 }
 0x824   :  { %v863_v1 = vpop.f32.mrb[8].mxu1 }
 0x825   :  { %v864_v2 = vadd.f32 %v904_v0, %v863_v1  ;;  %v1034_v3 = vpop.f32.mrb[9].mxu1 }
 0x827   :  { %868 = vst.msk [vmem:[#allocation7] sm:$0x3] %vm867_vm7, %v864_v2 }
 0x828   :  { %1148 = shalt.err (!%p1145_p6)
}
 0x829   :  { %s1149_s15 = scalar_lea.hbm %s1357_s6, 32 }
 0x82a   :  { %p1150_p7 = scmp.ne.s32.totalorder %s1357_s6, %s1149_s15  ;;  %p1153_p8 = scmp.lt.u32.totalorder %s1149_s15, %s1357_s6 }
 0x82c   :  { %p1155_p9 = pnand %p1153_p8, %p1150_p7 }
 0x82e   :  { %1158 = shalt.err (!%p1155_p9)
}
 0x82f   :  { %878 = dma.vmem_to_hbm [thread:$0]  %s876_s12, 32, %s1357_s6, [#allocation4]  }
 0x830   :  { %1163 = dma.done.wait [#allocation4], 32  }
 0x831   :  { %1164 = vsyncadd [#allocation4], 4294967264 }
 0x832   :  { %882 = vsyncpa [#allocation3], 1 }
 0x833   :  { %883 = vsyncpa [#allocation6], 1 }
 0x834   :  { %884 = vsyncpa [#allocation4], 1 }

</bundles_post_ra>
